<compile_context>
chip_gen: v7x
topology: tpu7x:2x2x1
jax: 0.10.0
libtpu: 0.0.40
codegen_flags: <defaults>
</compile_context>

<pallas_src>
import math
import functools

import jax
import jax.numpy as jnp
from jax.experimental import pallas as pl
from jax.experimental.pallas import tpu as pltpu


# ----------------------------------------------------------------------------
# Parameter / buffer setup (mirrors PyTorch __init__; not the hot path)
# ----------------------------------------------------------------------------
def make_positional_encoding_table(d_model: int, max_len: int = 500) -> jnp.ndarray:
    """(max_len, d_model) sinusoidal table, identical to the PyTorch buffer."""
    position = jnp.arange(0, max_len, dtype=jnp.float32)[:, None]            # (L, 1)
    div_term = jnp.exp(
        jnp.arange(0, d_model, 2, dtype=jnp.float32) * -(math.log(10000.0) / d_model)
    )                                                                         # (D/2,)
    angles = position * div_term                                              # (L, D/2)
    pe = jnp.zeros((max_len, d_model), dtype=jnp.float32)
    pe = pe.at[:, 0::2].set(jnp.sin(angles))
    pe = pe.at[:, 1::2].set(jnp.cos(angles))
    return pe


# ----------------------------------------------------------------------------
# Kernels (operate on flattened (B, S*D) layout)
# ----------------------------------------------------------------------------
def _pe_add_kernel(x_ref, pe_ref, o_ref):
    """Eval mode: out = x + pe (pe broadcast over the batch/sublane axis)."""
    # x_ref: (TB, TC), pe_ref: (1, TC)
    o_ref[...] = (x_ref[...] + pe_ref[...]).astype(o_ref.dtype)


def _hash_keep_mask(seed_u32, shape, row0, col0, threshold: int):
    """Stateless per-element Bernoulli(keep) mask via an integer hash.

    keep iff hash(seed, global_row, global_col) >= threshold, threshold ~ p*2^32.
    Portable (plain integer VPU ops) — works on TPU and in interpret mode.
    """
    tb, tc = shape
    rows = jax.lax.broadcasted_iota(jnp.int32, shape, 0) + row0
    cols = jax.lax.broadcasted_iota(jnp.int32, shape, 1) + col0
    k = (rows.astype(jnp.uint32) * jnp.uint32(0x9E3779B1)
         + cols.astype(jnp.uint32) * jnp.uint32(0x85EBCA77)
         + seed_u32)
    # murmur3 fmix32 finalizer
    k = k ^ (k >> jnp.uint32(16))
    k = k * jnp.uint32(0x85EBCA6B)
    k = k ^ (k >> jnp.uint32(13))
    k = k * jnp.uint32(0xC2B2AE35)
    k = k ^ (k >> jnp.uint32(16))
    return k >= jnp.uint32(threshold)


def _pe_add_dropout_kernel(x_ref, pe_ref, seed_ref, o_ref, *,
                           threshold: int, scale: float):
    """Train mode: out = inverted-dropout(x + pe, p)."""
    y = x_ref[...] + pe_ref[...]                      # (TB, TC)
    tb, tc = y.shape
    row0 = pl.program_id(0) * tb
    col0 = pl.program_id(1) * tc
    keep = _hash_keep_mask(seed_ref[0].astype(jnp.uint32), (tb, tc),
                           row0, col0, threshold)
    scaled = y * jnp.asarray(scale, dtype=y.dtype)
    o_ref[...] = jnp.where(keep, scaled, jnp.zeros_like(y)).astype(o_ref.dtype)


# ----------------------------------------------------------------------------
# Wrapper
# ----------------------------------------------------------------------------
def _choose_tiles(B: int, N: int, itemsize: int):
    """Pick (tile_b, tile_c): lane-dense flat tiles of ~1 MiB per x block."""
    tile_b = B if B <= 8 else 8                       # full dim or multiple of 8
    budget_elems = (1 << 20) // max(1, tile_b * itemsize)
    tile_c = max(128, (budget_elems // 128) * 128)    # multiple of 128 (lane-dense)
    if tile_c >= N:
        tile_c = N                                    # full flattened dim is always legal
    return tile_b, tile_c


def positional_encoding_forward(
    x: jnp.ndarray,
    pe_table: jnp.ndarray,
    *,
    dropout_p: float = 0.1,
    training: bool = False,
    seed: int = 0,
) -> jnp.ndarray:
    """x: (B, S, D).  pe_table: (max_len, D) float32.  Returns (B, S, D)."""
    B, S, D = x.shape
    assert pe_table.shape[1] == D and pe_table.shape[0] >= S

    N = S * D
    x2 = x.reshape(B, N)                                          # lane-dense view
    pe2 = pe_table[:S, :].astype(x.dtype).reshape(1, N)           # cast once, outside

    tile_b, tile_c = _choose_tiles(B, N, jnp.dtype(x.dtype).itemsize)
    grid = (pl.cdiv(B, tile_b), pl.cdiv(N, tile_c))

    x_spec = pl.BlockSpec((tile_b, tile_c), lambda i, j: (i, j))
    pe_spec = pl.BlockSpec((1, tile_c), lambda i, j: (0, j))
    out_spec = pl.BlockSpec((tile_b, tile_c), lambda i, j: (i, j))
    out_shape = jax.ShapeDtypeStruct((B, N), x.dtype)
    cparams = pltpu.CompilerParams(
        dimension_semantics=("parallel", "parallel"))             # feed both v7x TCs

    if (not training) or dropout_p == 0.0:
        out2 = pl.pallas_call(
            _pe_add_kernel,
            grid=grid,
            in_specs=[x_spec, pe_spec],
            out_specs=out_spec,
            out_shape=out_shape,
            compiler_params=cparams,
        )(x2, pe2)
    else:
        p = float(dropout_p)
        threshold = min((1 << 32) - 1, int(round(p * (1 << 32))))
        scale = 1.0 / (1.0 - p)
        kern = functools.partial(_pe_add_dropout_kernel,
                                 threshold=threshold, scale=scale)
        seed_arr = jnp.asarray([seed], dtype=jnp.int32)
        out2 = pl.pallas_call(
            kern,
            grid=grid,
            in_specs=[
                x_spec,
                pe_spec,
                pl.BlockSpec(memory_space=pltpu.MemorySpace.SMEM),
            ],
            out_specs=out_spec,
            out_shape=out_shape,
            compiler_params=cparams,
        )(x2, pe2, seed_arr)

    return out2.reshape(B, S, D)


# ----------------------------------------------------------------------------
# Demo
# ----------------------------------------------------------------------------
if __name__ == "__main__":
    key = jax.random.PRNGKey(0)
    B, S, D = 2, 8, 32
    x = jax.random.normal(key, (B, S, D), dtype=jnp.float32)

    pe_table = make_positional_encoding_table(d_model=D, max_len=500)

    # Eval-mode forward (dropout = identity): must match plain-JAX reference.
    out = positional_encoding_forward(x, pe_table, dropout_p=0.1, training=False)
    out = jax.block_until_ready(out)
    ref = x + pe_table[:S, :][None, :, :]
    assert out.shape == (B, S, D)
    assert jnp.allclose(out, ref, atol=1e-6), "eval-mode mismatch vs reference"

    # Train-mode forward (inverted dropout): kept elements must equal ref/(1-p).
    p = 0.1
    out_train = positional_encoding_forward(
        x, pe_table, dropout_p=p, training=True, seed=42
    )
    out_train = jax.block_until_ready(out_train)
    assert out_train.shape == (B, S, D)
    keep_mask = out_train != 0.0
    scale = 1.0 / (1.0 - p)
    assert jnp.allclose(
        jnp.where(keep_mask, out_train, 0.0),
        jnp.where(keep_mask, ref * scale, 0.0),
        atol=1e-5, rtol=1e-5,
    ), "train-mode kept elements do not match scaled reference"

    print("KERNEL_OK")
</pallas_src>

<mosaic_0001>
module attributes {stable_mosaic.version = 11 : i64} {
  func.func @_pe_add_kernel(%arg0: i32, %arg1: i32, %arg2: memref<2x256xf32, #tpu.memory_space<vmem>>, %arg3: memref<1x256xf32, #tpu.memory_space<vmem>>, %arg4: memref<2x256xf32, #tpu.memory_space<vmem>>) attributes {dimension_semantics = [#tpu.dimension_semantics<parallel>, #tpu.dimension_semantics<parallel>], iteration_bounds = array<i64: 1, 1>, scalar_prefetch = 0 : i64, scratch_operands = 0 : i64, tpu.core_type = #tpu.core_type<tc>, window_params = [{transform_indices = @transform_0, window_bounds = array<i64: 2, 256>}, {transform_indices = @transform_1, window_bounds = array<i64: 1, 256>}, {transform_indices = @transform_2, window_bounds = array<i64: 2, 256>}]} {
    %c0 = arith.constant 0 : index
    %c0_0 = arith.constant 0 : index
    %0 = vector.load %arg2[%c0, %c0_0] : memref<2x256xf32, #tpu.memory_space<vmem>>, vector<2x256xf32>
    %c0_1 = arith.constant 0 : index
    %c0_2 = arith.constant 0 : index
    %1 = vector.load %arg3[%c0_1, %c0_2] : memref<1x256xf32, #tpu.memory_space<vmem>>, vector<1x256xf32>
    %2 = vector.broadcast %1 : vector<1x256xf32> to vector<2x256xf32>
    %3 = arith.addf %0, %2 : vector<2x256xf32>
    %c0_3 = arith.constant 0 : index
    %c0_4 = arith.constant 0 : index
    %4 = vector.load %arg4[%c0_3, %c0_4] : memref<2x256xf32, #tpu.memory_space<vmem>>, vector<2x256xf32>
    tpu.vector_store %arg4[%c0_3, %c0_4], %3 {strides = array<i32>} : memref<2x256xf32, #tpu.memory_space<vmem>>, vector<2x256xf32>,
    return
  }
  func.func @transform_0(%arg0: i32, %arg1: i32) -> (i32, i32) {
    %c0_i32 = arith.constant 0 : i32
    return %arg0, %arg1 : i32, i32
  }
  func.func @transform_1(%arg0: i32, %arg1: i32) -> (i32, i32) {
    %c0_i32 = arith.constant 0 : i32
    %c0_i32_0 = arith.constant 0 : i32
    return %c0_i32, %arg1 : i32, i32
  }
  func.func @transform_2(%arg0: i32, %arg1: i32) -> (i32, i32) {
    %c0_i32 = arith.constant 0 : i32
    return %arg0, %arg1 : i32, i32
  }
}

</mosaic_0001>

<bundles_post_ra>
// kernel: tpu_custom_call.1
= control target key start
LH: loop header
LB: loop body
LE: loop exit
PB: predicated region body
PF: predicated region fallthrough
CT: control target
= control target key end

     0   :  { %7 = vsyncpa [#allocation3], 0  ;;  %s157_s0 = inlined_call_operand.hbm [shape: f32[2,256], index: 0, kind: input, shape index: {}]   ;;  %s158_s1 = inlined_call_operand.vmem [shape: f32[1,256], index: 1, kind: input, shape index: {}]   ;;  %s159_s2 = inlined_call_operand.hbm [shape: f32[2,256], index: 2, kind: output, shape index: {}]  }
   0x1   :  { %8 = vsyncpa [#allocation4], 0  ;;  %s112_s9 = smov [#allocation2]   ;;  %s64_s13 = scalar_lea.hbm %s157_s0, 64 }
   0x2   :  { %s15_s10 = sshll.u32 %s112_s9, 4  ;;  %p65_p0 = scmp.ne.s32.totalorder %s157_s0, %s64_s13  ;;  %s16_s10 = int_to_ptr.vmem [resolvable:$true] %s15_s10 }
   0x3   :  { %p68_p1 = scmp.lt.u32.totalorder %s64_s13, %s157_s0 }
   0x5   :  { %p70_p2 = pnand %p68_p1, %p65_p0 }
   0x7   :  { %73 = shalt.err (!%p70_p2)
}
   0x8   :  { %s74_s18 = scalar_lea.vmem %s16_s10, 64  ;;  %p79_p4 = scmp.lt.s32.totalorder %s16_s10, %s16_s10 }
   0x9   :  { %p75_p3 = scmp.ne.s32.totalorder %s16_s10, %s74_s18  ;;  %p80_p5 = scmp.lt.s32.totalorder %s74_s18, %s74_s18 }
   0xb   :  { %p81_p6 = por %p80_p5, %p79_p4 }
   0xd   :  { %p82_p7 = pnand %p81_p6, %p75_p3 }
   0xf   :  { %85 = shalt.err (!%p82_p7)
}
  0x10   :  { %18 = dma.hbm_to_vmem [thread:$0]  %s157_s0, 64, %s16_s10, [#allocation3]  }
  0x11   :  { %108 = dma.done.wait [#allocation3], 64  }
  0x12   :  { %109 = vsyncadd [#allocation3], 4294967232  ;;  %v27_v0 = vlaneseq  ;;  %v113_v1 = vmov 1983009808   ;;  %v25_v7 = vld [vmem:[%s158_s1] sm:$0x3] }
  0x13   :  { %v37_v2 = vunpack.c.l.s4 %v113_v1  ;;  %v24_v12 = vld [vmem:[#allocation2] sm:$0xf]  ;;  %s114_s23 = smov [#allocation5]  }
  0x14   :  { %v28_v3 = vshrl.u32 %v27_v0, 7  ;;  %s52_s0 = sshll.u32 %s114_s23, 4  ;;  %s53_s0 = int_to_ptr.vmem [resolvable:$true] %s52_s0 }
  0x15   :  { %v38_v6 = vunpack.c.0.s8 %v37_v2  ;;  %s86_s24 = scalar_lea.vmem %s53_s0, 64  ;;  %p91_p9 = scmp.lt.s32.totalorder %s53_s0, %s53_s0 }
  0x16   :  { %v29_v4 = vsub.s32 0, %v28_v3  ;;  %v33_v5 = vsub.s32 1, %v28_v3  ;;  %p87_p8 = scmp.ne.s32.totalorder %s53_s0, %s86_s24  ;;  %p92_p10 = scmp.lt.s32.totalorder %s86_s24, %s86_s24 }
  0x17   :  { %v41_v10 = vsub.s32 %v38_v6, %v28_v3 }
  0x18   :  { %v30_v8 = vrot.slane %v25_v7, %v29_v4  ;;  %v34_v9 = vrot.slane %v25_v7, %v33_v5  ;;  %p93_p11 = por %p92_p10, %p91_p9 }
  0x1a   :  { %v35_v11 = vcombine.low %v30_v8, %v34_v9  ;;  %p94_p12 = pnand %p93_p11, %p87_p8 }
  0x1c   :  { %v42_v13 = vrot.slane %v35_v11, %v41_v10 }
  0x1e   :  { %v44_v14 = vadd.f32 %v42_v13, %v24_v12 }
  0x20   :  { %45 = vst [vmem:[#allocation5] sm:$0xf] %v44_v14 }
  0x21   :  { %97 = shalt.err (!%p94_p12)
}
  0x22   :  { %s98_s26 = scalar_lea.hbm %s159_s2, 64 }
  0x23   :  { %p99_p13 = scmp.ne.s32.totalorder %s159_s2, %s98_s26  ;;  %p102_p0 = scmp.lt.u32.totalorder %s98_s26, %s159_s2 }
  0x25   :  { %p104_p1 = pnand %p102_p0, %p99_p13 }
  0x27   :  { %107 = shalt.err (!%p104_p1)
}
  0x28   :  { %55 = dma.vmem_to_hbm [thread:$0]  %s53_s0, 64, %s159_s2, [#allocation4]  }
  0x29   :  { %110 = dma.done.wait [#allocation4], 64  }
  0x2a   :  { %111 = vsyncadd [#allocation4], 4294967232 }
  0x2b   :  { %59 = vsyncpa [#allocation3], 1 }
  0x2c   :  { %60 = vsyncpa [#allocation4], 1 }

</bundles_post_ra>
